<compile_context>
chip_gen: v6e
topology: v6e:2x2x1
jax: 0.10.0
libtpu: 0.0.40
codegen_flags: <defaults>
</compile_context>

<pallas_src>
import functools

import jax
import jax.numpy as jnp
from jax.experimental import pallas as pl
from jax.experimental.pallas import tpu as pltpu


LANE = 128  # lane width / padding unit


def _round_up(x, m):
    return -(-x // m) * m


def _mlp_kernel(x_ref, w_ref, b_ref, o_ref, *, num_layers, in_pad, bf16_tanh):
    """Fully fused forward pass for one batch tile.

    x_ref: [bm, in_pad]  bf16 narrow input tile (in_pad = in_dim rounded to 8)
    w_ref: [L, P, P]     bf16 packed weights (resident)
    b_ref: [L, 1, P]     f32  packed biases (resident)
    o_ref: [bm, P]       bf16 output tile (lane-dense)
    """
    def activate(acc_f32):
        # acc_f32: f32 matmul result + f32 bias. tanh in bf16 on v6e/v7x (bf16 EUP),
        # f32 on v5e; either way the next layer consumes bf16.
        if bf16_tanh:
            return jnp.tanh(acc_f32.astype(jnp.bfloat16))
        return jnp.tanh(acc_f32).astype(jnp.bfloat16)

    # Layer 0: narrow-K matmul against the first in_pad rows of the padded W0.
    acc = jnp.dot(x_ref[...], w_ref[0, :in_pad, :],
                  preferred_element_type=jnp.float32) + b_ref[0]
    h = activate(acc)

    # Remaining hidden layers (lane-dense 128x128 bf16 matmuls, f32 accumulate).
    for l in range(1, num_layers - 1):
        acc = jnp.dot(h, w_ref[l], preferred_element_type=jnp.float32) + b_ref[l]
        h = activate(acc)

    # Final linear layer (no activation); store bf16.
    last = num_layers - 1
    acc = jnp.dot(h, w_ref[last], preferred_element_type=jnp.float32) + b_ref[last]
    # TODO(synk): if block_rows is pushed to 1024+, process this epilogue in row
    # strips (lax.fori_loop(unroll=True)) should the bundle dump show vreg spills.
    o_ref[...] = acc.astype(o_ref.dtype)


def _bf16_eup_supported():
    """bf16 tanh only on v6e / v7x (v5e and older have no bf16 EUP/VPU)."""
    try:
        kind = jax.devices()[0].device_kind.lower()
    except Exception:  # pragma: no cover
        return False
    return any(tag in kind for tag in ("v6", "v7", "7x"))


def _choose_block_rows(batch):
    """Sublane-aligned batch tile.

    Small batches: one tile covering the whole (rounded-up) batch.
    Large batches: pick from {128, 256, 512} minimizing padding waste, preferring
    >=2 grid steps so both v7x TensorCores get work.
    """
    aligned = max(8, _round_up(batch, 8))
    if aligned <= 256:
        return aligned  # single step; block == full padded array (always legal)

    candidates = (128, 256, 512)

    def waste(br):
        return br * _round_up(batch, br) // br * br - batch if False else \
            br * (-(-batch // br)) - batch

    best = min(candidates, key=lambda br: (waste(br), -br))
    if -(-batch // best) < 2:
        multi = [br for br in candidates if -(-batch // br) >= 2]
        if multi:
            best = min(multi, key=lambda br: (waste(br), -br))
    return best


def pack_q_net_params(params, in_dim):
    """Pack + zero-pad all layer weights/biases ONCE (call when params change).

    Returns:
      w_packed: [L, P, P] bf16
      b_packed: [L, 1, P] f32
    Zero padding is exact: tanh(0)=0 feeds zero rows of the next padded W.
    """
    max_dim = max([in_dim] + [w.shape[1] for (w, _) in params])
    P = LANE * (-(-max_dim // LANE))
    w_packed = jnp.stack([
        jnp.pad(w.astype(jnp.float32),
                ((0, P - w.shape[0]), (0, P - w.shape[1])))
        for (w, _) in params
    ]).astype(jnp.bfloat16)
    b_packed = jnp.stack([
        jnp.pad(b.astype(jnp.float32), (0, P - b.shape[0])).reshape(1, P)
        for (_, b) in params
    ])
    return w_packed, b_packed


def q_net_forward(x, w_packed, b_packed, *, out_dim, block_rows=None, bf16_tanh=None):
    """x: [B, in_dim] f32. w_packed: [L,P,P] bf16, b_packed: [L,1,P] f32 (pre-packed)."""
    B, in_dim = x.shape
    L, P, _ = w_packed.shape
    in_pad = max(8, _round_up(in_dim, 8))
    assert in_pad <= P

    if bf16_tanh is None:
        bf16_tanh = _bf16_eup_supported()
    if block_rows is None:
        block_rows = _choose_block_rows(B)
    assert block_rows % 8 == 0, "block_rows must be a multiple of 8 (sublane tile)"
    Bp = block_rows * (-(-B // block_rows))

    # Narrow input: pad batch to Bp and features only to in_pad (multiple of 8).
    x_p = jnp.zeros((Bp, in_pad), jnp.bfloat16).at[:B, :in_dim].set(
        x.astype(jnp.bfloat16))

    out_padded = pl.pallas_call(
        functools.partial(_mlp_kernel, num_layers=L, in_pad=in_pad,
                          bf16_tanh=bf16_tanh),
        out_shape=jax.ShapeDtypeStruct((Bp, P), jnp.bfloat16),
        grid=(Bp // block_rows,),
        in_specs=[
            pl.BlockSpec((block_rows, in_pad), lambda i: (i, 0)),  # narrow x tile
            pl.BlockSpec((L, P, P), lambda i: (0, 0, 0)),          # resident weights
            pl.BlockSpec((L, 1, P), lambda i: (0, 0, 0)),          # resident biases
        ],
        out_specs=pl.BlockSpec((block_rows, P), lambda i: (i, 0)),
        compiler_params=pltpu.CompilerParams(
            dimension_semantics=("parallel",)),
    )(x_p, w_packed, b_packed)

    # Slice away batch padding and lane padding; return f32 like the torch module.
    return out_padded[:B, :out_dim].astype(jnp.float32)


def init_q_net_params(key, in_dim, out_dim, hid_dim=50, num_layers=4):
    """Deterministic init mirroring nn.Linear default (U(-1/sqrt(fan_in), 1/sqrt(fan_in)))."""
    dims = [in_dim] + [hid_dim] * num_layers + [out_dim]
    params = []
    for li in range(len(dims) - 1):
        fan_in, fan_out = dims[li], dims[li + 1]
        key, kw, kb = jax.random.split(key, 3)
        bound = 1.0 / (fan_in ** 0.5)
        w = jax.random.uniform(kw, (fan_in, fan_out), jnp.float32, -bound, bound)
        b = jax.random.uniform(kb, (fan_out,), jnp.float32, -bound, bound)
        params.append((w, b))
    return params


def q_net_reference(x, params):
    h = x
    for (w, b) in params[:-1]:
        h = jnp.tanh(h @ w + b)
    w, b = params[-1]
    return h @ w + b


if __name__ == "__main__":
    key = jax.random.PRNGKey(0)
    in_dim, out_dim, hid_dim, num_layers = 4, 2, 50, 4
    batch = 8

    kx, kp = jax.random.split(key)
    x = jax.random.normal(kx, (batch, in_dim), jnp.float32)
    params = init_q_net_params(kp, in_dim, out_dim, hid_dim, num_layers)

    # Pack once (outside the forward / jit region).
    w_packed, b_packed = pack_q_net_params(params, in_dim)

    forward = jax.jit(functools.partial(q_net_forward, out_dim=out_dim))
    out = forward(x, w_packed, b_packed)
    out = jax.block_until_ready(out)

    ref = q_net_reference(x, params)
    assert out.shape == (batch, out_dim)
    # bf16 MXU operands / bf16 tanh (v6e+) / bf16 output -> loose tolerance vs f32 ref.
    assert jnp.allclose(out, ref, atol=6e-2, rtol=6e-2), \
        f"max abs err {jnp.max(jnp.abs(out - ref))}"

    print("KERNEL_OK")
</pallas_src>

<mosaic_0001>
module attributes {stable_mosaic.version = 11 : i64} {
  func.func @_mlp_kernel(%arg0: i32, %arg1: memref<8x8xbf16, #tpu.memory_space<vmem>>, %arg2: memref<5x128x128xbf16, #tpu.memory_space<vmem>>, %arg3: memref<5x1x128xf32, #tpu.memory_space<vmem>>, %arg4: memref<8x128xbf16, #tpu.memory_space<vmem>>) attributes {dimension_semantics = [#tpu.dimension_semantics<parallel>], iteration_bounds = array<i64: 1>, scalar_prefetch = 0 : i64, scratch_operands = 0 : i64, tpu.core_type = #tpu.core_type<tc>, window_params = [{transform_indices = @transform_0, window_bounds = array<i64: 8, 8>}, {pipeline_mode = #tpu.pipeline_mode<synchronous>, transform_indices = @transform_1, window_bounds = array<i64: 5, 128, 128>}, {pipeline_mode = #tpu.pipeline_mode<synchronous>, transform_indices = @transform_2, window_bounds = array<i64: 5, 1, 128>}, {transform_indices = @transform_3, window_bounds = array<i64: 8, 128>}]} {
    %c0 = arith.constant 0 : index
    %c0_0 = arith.constant 0 : index
    %0 = vector.load %arg1[%c0, %c0_0] : memref<8x8xbf16, #tpu.memory_space<vmem>>, vector<8x8xbf16>
    %c0_1 = arith.constant 0 : index
    %c0_2 = arith.constant 0 : index
    %c0_3 = arith.constant 0 : index
    %1 = vector.load %arg2[%c0_1, %c0_2, %c0_3] : memref<5x128x128xbf16, #tpu.memory_space<vmem>>, vector<1x8x128xbf16>
    %2 = vector.shape_cast %1 : vector<1x8x128xbf16> to vector<8x128xbf16>
    %cst = arith.constant dense<0.000000e+00> : vector<8x128xf32>
    %3 = tpu.matmul %0, %2, %cst {dimension_numbers = #tpu.dot_dimension_numbers<[1], [0], [0], [1], [0, 0, 1, 1], [], []>} : vector<8x8xbf16>, vector<8x128xbf16>, vector<8x128xf32> -> vector<8x128xf32>
    %c0_4 = arith.constant 0 : index
    %c0_5 = arith.constant 0 : index
    %c0_6 = arith.constant 0 : index
    %4 = vector.load %arg3[%c0_4, %c0_5, %c0_6] : memref<5x1x128xf32, #tpu.memory_space<vmem>>, vector<1x1x128xf32>
    %5 = vector.shape_cast %4 : vector<1x1x128xf32> to vector<1x128xf32>
    %6 = vector.broadcast %5 : vector<1x128xf32> to vector<8x128xf32>
    %7 = arith.addf %3, %6 : vector<8x128xf32>
    %8 = math.tanh %7 : vector<8x128xf32>
    %9 = arith.truncf %8 : vector<8x128xf32> to vector<8x128xbf16>
    %c1 = arith.constant 1 : index
    %c0_7 = arith.constant 0 : index
    %c0_8 = arith.constant 0 : index
    %10 = vector.load %arg2[%c1, %c0_7, %c0_8] : memref<5x128x128xbf16, #tpu.memory_space<vmem>>, vector<1x128x128xbf16>
    %11 = vector.shape_cast %10 : vector<1x128x128xbf16> to vector<128x128xbf16>
    %cst_9 = arith.constant dense<0.000000e+00> : vector<8x128xf32>
    %12 = tpu.matmul %9, %11, %cst_9 {dimension_numbers = #tpu.dot_dimension_numbers<[1], [0], [0], [1], [0, 0, 1, 1], [], []>} : vector<8x128xbf16>, vector<128x128xbf16>, vector<8x128xf32> -> vector<8x128xf32>
    %c1_10 = arith.constant 1 : index
    %c0_11 = arith.constant 0 : index
    %c0_12 = arith.constant 0 : index
    %13 = vector.load %arg3[%c1_10, %c0_11, %c0_12] : memref<5x1x128xf32, #tpu.memory_space<vmem>>, vector<1x1x128xf32>
    %14 = vector.shape_cast %13 : vector<1x1x128xf32> to vector<1x128xf32>
    %15 = vector.broadcast %14 : vector<1x128xf32> to vector<8x128xf32>
    %16 = arith.addf %12, %15 : vector<8x128xf32>
    %17 = math.tanh %16 : vector<8x128xf32>
    %18 = arith.truncf %17 : vector<8x128xf32> to vector<8x128xbf16>
    %c2 = arith.constant 2 : index
    %c0_13 = arith.constant 0 : index
    %c0_14 = arith.constant 0 : index
    %19 = vector.load %arg2[%c2, %c0_13, %c0_14] : memref<5x128x128xbf16, #tpu.memory_space<vmem>>, vector<1x128x128xbf16>
    %20 = vector.shape_cast %19 : vector<1x128x128xbf16> to vector<128x128xbf16>
    %cst_15 = arith.constant dense<0.000000e+00> : vector<8x128xf32>
    %21 = tpu.matmul %18, %20, %cst_15 {dimension_numbers = #tpu.dot_dimension_numbers<[1], [0], [0], [1], [0, 0, 1, 1], [], []>} : vector<8x128xbf16>, vector<128x128xbf16>, vector<8x128xf32> -> vector<8x128xf32>
    %c2_16 = arith.constant 2 : index
    %c0_17 = arith.constant 0 : index
    %c0_18 = arith.constant 0 : index
    %22 = vector.load %arg3[%c2_16, %c0_17, %c0_18] : memref<5x1x128xf32, #tpu.memory_space<vmem>>, vector<1x1x128xf32>
    %23 = vector.shape_cast %22 : vector<1x1x128xf32> to vector<1x128xf32>
    %24 = vector.broadcast %23 : vector<1x128xf32> to vector<8x128xf32>
    %25 = arith.addf %21, %24 : vector<8x128xf32>
    %26 = math.tanh %25 : vector<8x128xf32>
    %27 = arith.truncf %26 : vector<8x128xf32> to vector<8x128xbf16>
    %c3 = arith.constant 3 : index
    %c0_19 = arith.constant 0 : index
    %c0_20 = arith.constant 0 : index
    %28 = vector.load %arg2[%c3, %c0_19, %c0_20] : memref<5x128x128xbf16, #tpu.memory_space<vmem>>, vector<1x128x128xbf16>
    %29 = vector.shape_cast %28 : vector<1x128x128xbf16> to vector<128x128xbf16>
    %cst_21 = arith.constant dense<0.000000e+00> : vector<8x128xf32>
    %30 = tpu.matmul %27, %29, %cst_21 {dimension_numbers = #tpu.dot_dimension_numbers<[1], [0], [0], [1], [0, 0, 1, 1], [], []>} : vector<8x128xbf16>, vector<128x128xbf16>, vector<8x128xf32> -> vector<8x128xf32>
    %c3_22 = arith.constant 3 : index
    %c0_23 = arith.constant 0 : index
    %c0_24 = arith.constant 0 : index
    %31 = vector.load %arg3[%c3_22, %c0_23, %c0_24] : memref<5x1x128xf32, #tpu.memory_space<vmem>>, vector<1x1x128xf32>
    %32 = vector.shape_cast %31 : vector<1x1x128xf32> to vector<1x128xf32>
    %33 = vector.broadcast %32 : vector<1x128xf32> to vector<8x128xf32>
    %34 = arith.addf %30, %33 : vector<8x128xf32>
    %35 = math.tanh %34 : vector<8x128xf32>
    %36 = arith.truncf %35 : vector<8x128xf32> to vector<8x128xbf16>
    %c4 = arith.constant 4 : index
    %c0_25 = arith.constant 0 : index
    %c0_26 = arith.constant 0 : index
    %37 = vector.load %arg2[%c4, %c0_25, %c0_26] : memref<5x128x128xbf16, #tpu.memory_space<vmem>>, vector<1x128x128xbf16>
    %38 = vector.shape_cast %37 : vector<1x128x128xbf16> to vector<128x128xbf16>
    %cst_27 = arith.constant dense<0.000000e+00> : vector<8x128xf32>
    %39 = tpu.matmul %36, %38, %cst_27 {dimension_numbers = #tpu.dot_dimension_numbers<[1], [0], [0], [1], [0, 0, 1, 1], [], []>} : vector<8x128xbf16>, vector<128x128xbf16>, vector<8x128xf32> -> vector<8x128xf32>
    %c4_28 = arith.constant 4 : index
    %c0_29 = arith.constant 0 : index
    %c0_30 = arith.constant 0 : index
    %40 = vector.load %arg3[%c4_28, %c0_29, %c0_30] : memref<5x1x128xf32, #tpu.memory_space<vmem>>, vector<1x1x128xf32>
    %41 = vector.shape_cast %40 : vector<1x1x128xf32> to vector<1x128xf32>
    %42 = vector.broadcast %41 : vector<1x128xf32> to vector<8x128xf32>
    %43 = arith.addf %39, %42 : vector<8x128xf32>
    %44 = arith.truncf %43 : vector<8x128xf32> to vector<8x128xbf16>
    %c0_31 = arith.constant 0 : index
    %c0_32 = arith.constant 0 : index
    %45 = vector.load %arg4[%c0_31, %c0_32] : memref<8x128xbf16, #tpu.memory_space<vmem>>, vector<8x128xbf16>
    tpu.vector_store %arg4[%c0_31, %c0_32], %44 {strides = array<i32>} : memref<8x128xbf16, #tpu.memory_space<vmem>>, vector<8x128xbf16>,
    return
  }
  func.func @transform_0(%arg0: i32) -> (i32, i32) {
    %c0_i32 = arith.constant 0 : i32
    %c0_i32_0 = arith.constant 0 : i32
    return %arg0, %c0_i32 : i32, i32
  }
  func.func @transform_1(%arg0: i32) -> (i32, i32, i32) {
    %c0_i32 = arith.constant 0 : i32
    %c0_i32_0 = arith.constant 0 : i32
    %c0_i32_1 = arith.constant 0 : i32
    %c0_i32_2 = arith.constant 0 : i32
    return %c0_i32, %c0_i32_0, %c0_i32_1 : i32, i32, i32
  }
  func.func @transform_2(%arg0: i32) -> (i32, i32, i32) {
    %c0_i32 = arith.constant 0 : i32
    %c0_i32_0 = arith.constant 0 : i32
    %c0_i32_1 = arith.constant 0 : i32
    %c0_i32_2 = arith.constant 0 : i32
    return %c0_i32, %c0_i32_0, %c0_i32_1 : i32, i32, i32
  }
  func.func @transform_3(%arg0: i32) -> (i32, i32) {
    %c0_i32 = arith.constant 0 : i32
    %c0_i32_0 = arith.constant 0 : i32
    return %arg0, %c0_i32 : i32, i32
  }
}

</mosaic_0001>

<bundles_post_ra>
// kernel: q_net_forward.1
= control target key start
LH: loop header
LB: loop body
LE: loop exit
PB: predicated region body
PF: predicated region fallthrough
CT: control target
= control target key end

     0   :  { %8 = vsyncpa [#allocation3], 0  ;;  %s786_s12 = smov [#allocation2]   ;;  %s878_s0 = inlined_call_operand.vmem [shape: bf16[8,8], index: 0, kind: input, shape index: {}]   ;;  %s879_s1 = inlined_call_operand.hbm [shape: bf16[5,128,128], index: 1, kind: input, shape index: {}]   ;;  %s880_s2 = inlined_call_operand.vmem [shape: f32[5,1,128], index: 2, kind: input, shape index: {}]   ;;  %s881_s3 = inlined_call_operand.vmem [shape: bf16[8,128], index: 3, kind: output, shape index: {}]  }
   0x1   :  { %s16_s13 = sshll.u32 %s786_s12, 4  ;;  %s17_s13 = int_to_ptr.vmem [resolvable:$true] %s16_s13 }
   0x2   :  { %s772_s14 = scalar_lea.vmem %s17_s13, 5120  ;;  %p777_p1 = scmp.lt.s32.totalorder %s17_s13, %s17_s13 }
   0x3   :  { %p773_p0 = scmp.ne.s32.totalorder %s17_s13, %s772_s14  ;;  %p778_p2 = scmp.lt.s32.totalorder %s772_s14, %s772_s14 }
   0x5   :  { %p779_p3 = por %p778_p2, %p777_p1 }
   0x7   :  { %p780_p4 = pnand %p779_p3, %p773_p0 }
   0x9   :  { %783 = shalt.err (!%p780_p4)
}
   0xa   :  { %s787_s15 = smov 64   ;;  %s788_s16 = smov 4  }
   0xb   :  { %22 = dma.hbm_to_vmem [thread:$0]  %s879_s1, 5120, %s17_s13, [#allocation3], %s787_s15, %s787_s15, %s788_s16  }
   0xc   :  { %784 = dma.done.wait [#allocation3], 5120  }
   0xd   :  { %785 = vsyncadd [#allocation3], 4294962176  ;;  %v789_v0 = vmov 0.0   ;;  %vm790_vm0 = vmmov 0   ;;  %vm42_vm1 = vcmask 1043456   ;;  %vm38_vm2 = vcmask 64512  }
   0xe   :  { %633 = vmatprep.subr.bf16.mxu0 %v789_v0  ;;  %635 = vmatprep.mubr.msk.bf16.mxu0 %vm790_vm0, %v789_v0  ;;  %v30_v1 = vld [vmem:[#allocation2] sm:$0xf]  ;;  %v724_v3 = vld [vmem:[#allocation2 + $0x78] sm:$0xff]   ;;  %v725_v5 = vld [vmem:[#allocation2 + $0x70] sm:$0xff]  }
   0xf   :  { %639 = vmatprep.subr.bf16.mxu1 %v789_v0  ;;  %655 = vmatprep.mubr.msk.bf16.mxu1 %vm790_vm0, %v789_v0  ;;  %v44_v2 = vsel %vm42_vm1, %v30_v1, 0  ;;  %v29_v4 = vld [vmem:[%s878_s0] sm:$0xf]  ;;  %v726_v6 = vld [vmem:[#allocation2 + $0x68] sm:$0xff]   ;;  %v728_v8 = vld [vmem:[#allocation2 + $0x58] sm:$0xff]  }
  0x10   :  { %634 = vmatpush3.bf16.msra.mxu0 %v44_v2  ;;  %640 = vmatpush3.bf16.msra.mxu1 %v724_v3  ;;  %v727_v7 = vld [vmem:[#allocation2 + $0x60] sm:$0xff]   ;;  %v729_v9 = vld [vmem:[#allocation2 + $0x50] sm:$0xff]   ;;  %v730_v10 = vld [vmem:[#allocation2 + $0x48] sm:$0xff]  }
  0x11   :  { %659 = vmatprep.subr.bf16.mxu0 %v789_v0  ;;  %641 = vmatprep.subr.bf16.mxu1 %v789_v0  ;;  %v731_v11 = vld [vmem:[#allocation2 + $0x40] sm:$0xff]   ;;  %v732_v12 = vld [vmem:[#allocation2 + $0xb8] sm:$0xff]   ;;  %v733_v13 = vld [vmem:[#allocation2 + $0xb0] sm:$0xff]  }
  0x12   :  { %v734_v14 = vld [vmem:[#allocation2 + $0xa8] sm:$0xff]   ;;  %v553_v15 = vld [vmem:[%s880_s2] ss:$0 sm:$0xff]  ;;  %v736_v24 = vld [vmem:[#allocation2 + $0x98] sm:$0xff]  }
  0x13   :  { %636 = vmatmul.mubr.msk.bf16.vlgmr.msra.gmra.mxu0 %vm38_vm2, %v29_v4  ;;  %v735_v23 = vld [vmem:[#allocation2 + $0xa0] sm:$0xff]   ;;  %v737_v25 = vld [vmem:[#allocation2 + $0x90] sm:$0xff]   ;;  %v738_v26 = vld [vmem:[#allocation2 + $0x88] sm:$0xff]  }
  0x14   :  { %675 = vmatprep.mubr.msk.bf16.mxu0 %vm790_vm0, %v789_v0  ;;  %642 = vmatpush3.bf16.msra.mxu1 %v725_v5  ;;  %v739_v27 = vld [vmem:[#allocation2 + $0x80] sm:$0xff]   ;;  %v740_v28 = vld [vmem:[#allocation2 + $0xf8] sm:$0xff]   ;;  %v741_v29 = vld [vmem:[#allocation2 + $0xf0] sm:$0xff]  }
  0x15   :  { %643 = vmatprep.subr.bf16.mxu1 %v789_v0  ;;  %660 = vmatpush3.bf16.msra.mxu0 %v732_v12  ;;  %v742_v30 = vld [vmem:[#allocation2 + $0xe8] sm:$0xff]   ;;  %v556_v31 = vld [vmem:[%s880_s2 + $0x1] ss:$0 sm:$0xff]  ;;  %v744_v40 = vld [vmem:[#allocation2 + $0xd8] sm:$0xff]  }
  0x16   :  { %661 = vmatprep.subr.bf16.mxu0 %v789_v0  ;;  %v743_v39 = vld [vmem:[#allocation2 + $0xe0] sm:$0xff]   ;;  %v745_v41 = vld [vmem:[#allocation2 + $0xd0] sm:$0xff]   ;;  %v746_v42 = vld [vmem:[#allocation2 + $0xc8] sm:$0xff]  }
  0x17   :  { %v747_v43 = vld [vmem:[#allocation2 + $0xc0] sm:$0xff]   ;;  %v748_v44 = vld [vmem:[#allocation2 + $0x138] sm:$0xff]   ;;  %v749_v45 = vld [vmem:[#allocation2 + $0x130] sm:$0xff]  }
  0x18   :  { %644 = vmatpush3.bf16.msra.mxu1 %v726_v6  ;;  %v750_v46 = vld [vmem:[#allocation2 + $0x128] sm:$0xff]   ;;  %v566_v47 = vld [vmem:[%s880_s2 + $0x2] ss:$0 sm:$0xff]  ;;  %v752_v56 = vld [vmem:[#allocation2 + $0x118] sm:$0xff]  }
  0x19   :  { %645 = vmatprep.subr.bf16.mxu1 %v789_v0  ;;  %662 = vmatpush3.bf16.msra.mxu0 %v733_v13  ;;  %v751_v55 = vld [vmem:[#allocation2 + $0x120] sm:$0xff]   ;;  %v753_v57 = vld [vmem:[#allocation2 + $0x110] sm:$0xff]   ;;  %v754_v58 = vld [vmem:[#allocation2 + $0x108] sm:$0xff]  }
  0x1a   :  { %663 = vmatprep.subr.bf16.mxu0 %v789_v0  ;;  %v755_v59 = vld [vmem:[#allocation2 + $0x100] sm:$0xff]  }
  0x1b   :  { %v576_v60 = vld [vmem:[%s880_s2 + $0x3] ss:$0 sm:$0xff]  ;;  %v586_v5 = vld [vmem:[%s880_s2 + $0x4] ss:$0 sm:$0xff] }
  0x1c   :  { %646 = vmatpush3.bf16.msra.mxu1 %v727_v7 }
  0x1d   :  { %647 = vmatprep.subr.bf16.mxu1 %v789_v0  ;;  %664 = vmatpush3.bf16.msra.mxu0 %v734_v14 }
  0x1e   :  { %665 = vmatprep.subr.bf16.mxu0 %v789_v0 }
  0x20   :  { %648 = vmatpush3.bf16.msra.mxu1 %v728_v8 }
  0x21   :  { %649 = vmatprep.subr.bf16.mxu1 %v789_v0  ;;  %666 = vmatpush3.bf16.msra.mxu0 %v735_v23 }
  0x22   :  { %667 = vmatprep.subr.bf16.mxu0 %v789_v0 }
  0x24   :  { %650 = vmatpush3.bf16.msra.mxu1 %v729_v9 }
  0x25   :  { %651 = vmatprep.subr.bf16.mxu1 %v789_v0  ;;  %668 = vmatpush3.bf16.msra.mxu0 %v736_v24 }
  0x26   :  { %669 = vmatprep.subr.bf16.mxu0 %v789_v0 }
  0x28   :  { %652 = vmatpush3.bf16.msra.mxu1 %v730_v10 }
  0x29   :  { %653 = vmatprep.subr.bf16.mxu1 %v789_v0  ;;  %670 = vmatpush3.bf16.msra.mxu0 %v737_v25 }
  0x2a   :  { %671 = vmatprep.subr.bf16.mxu0 %v789_v0 }
  0x2c   :  { %654 = vmatpush3.bf16.msra.mxu1 %v731_v11 }
  0x2d   :  { %679 = vmatprep.subr.bf16.mxu1 %v789_v0  ;;  %672 = vmatpush3.bf16.msra.mxu0 %v738_v26 }
  0x2e   :  { %673 = vmatprep.subr.bf16.mxu0 %v789_v0 }
  0x31   :  { %674 = vmatpush3.bf16.msra.mxu0 %v739_v27 }
  0x32   :  { %699 = vmatprep.subr.bf16.mxu0 %v789_v0 }
  0xd3   :  { %v80_v16 = vpop.f32.mrf.mxu0 }
  0xd4   :  { %v81_v17 = vadd.f32 %v553_v15, %v80_v16 }
  0xd5   :  { %v637_v18 = vpop.f32.mrf.mxu0 }
  0xd6   :  { %756 = vtanh.f32 %v81_v17 }
  0xd7   :  { %v83_v19 = vpop.f32.mrf.mxu0 }
  0xd9   :  { %v638_v20 = vpop.f32.mrf.mxu0 }
  0xe3   :  { %v757_v21 = vpop.eup %756 }
  0xe4   :  { %v87_v22 = vpack.c.bf16 %v757_v21, %v757_v21 }
  0xe6   :  { %656 = vmatmul.mubr.bf16.vlgmr.msra.gmra.mxu1 %v87_v22 }
  0xe7   :  { %695 = vmatprep.mubr.msk.bf16.mxu1 %vm790_vm0, %v789_v0  ;;  %680 = vmatpush3.bf16.msra.mxu1 %v740_v28 }
  0xe8   :  { %681 = vmatprep.subr.bf16.mxu1 %v789_v0 }
  0xeb   :  { %682 = vmatpush3.bf16.msra.mxu1 %v741_v29 }
  0xec   :  { %683 = vmatprep.subr.bf16.mxu1 %v789_v0 }
  0xef   :  { %684 = vmatpush3.bf16.msra.mxu1 %v742_v30 }
  0xf0   :  { %685 = vmatprep.subr.bf16.mxu1 %v789_v0 }
  0xf3   :  { %686 = vmatpush3.bf16.msra.mxu1 %v743_v39 }
  0xf4   :  { %687 = vmatprep.subr.bf16.mxu1 %v789_v0 }
  0xf7   :  { %688 = vmatpush3.bf16.msra.mxu1 %v744_v40 }
  0xf8   :  { %689 = vmatprep.subr.bf16.mxu1 %v789_v0 }
  0xfb   :  { %690 = vmatpush3.bf16.msra.mxu1 %v745_v41 }
  0xfc   :  { %691 = vmatprep.subr.bf16.mxu1 %v789_v0 }
  0xff   :  { %692 = vmatpush3.bf16.msra.mxu1 %v746_v42 }
 0x100   :  { %693 = vmatprep.subr.bf16.mxu1 %v789_v0 }
 0x103   :  { %694 = vmatpush3.bf16.msra.mxu1 %v747_v43 }
 0x1a6   :  { %v195_v32 = vpop.f32.mrf.mxu1 }
 0x1a7   :  { %v196_v33 = vadd.f32 %v556_v31, %v195_v32 }
 0x1a8   :  { %v657_v34 = vpop.f32.mrf.mxu1 }
 0x1a9   :  { %758 = vtanh.f32 %v196_v33 }
 0x1aa   :  { %v198_v35 = vpop.f32.mrf.mxu1 }
 0x1ac   :  { %v658_v36 = vpop.f32.mrf.mxu1 }
 0x1b6   :  { %v759_v37 = vpop.eup %758 }
 0x1b7   :  { %v202_v38 = vpack.c.bf16 %v759_v37, %v759_v37 }
 0x1b9   :  { %676 = vmatmul.mubr.bf16.vlgmr.msra.gmra.mxu0 %v202_v38 }
 0x1ba   :  { %715 = vmatprep.mubr.msk.bf16.mxu0 %vm790_vm0, %v789_v0  ;;  %700 = vmatpush3.bf16.msra.mxu0 %v748_v44 }
 0x1bb   :  { %701 = vmatprep.subr.bf16.mxu0 %v789_v0 }
 0x1be   :  { %702 = vmatpush3.bf16.msra.mxu0 %v749_v45 }
 0x1bf   :  { %703 = vmatprep.subr.bf16.mxu0 %v789_v0 }
 0x1c2   :  { %704 = vmatpush3.bf16.msra.mxu0 %v750_v46 }
 0x1c3   :  { %705 = vmatprep.subr.bf16.mxu0 %v789_v0 }
 0x1c6   :  { %706 = vmatpush3.bf16.msra.mxu0 %v751_v55 }
 0x1c7   :  { %707 = vmatprep.subr.bf16.mxu0 %v789_v0 }
 0x1ca   :  { %708 = vmatpush3.bf16.msra.mxu0 %v752_v56 }
 0x1cb   :  { %709 = vmatprep.subr.bf16.mxu0 %v789_v0 }
 0x1ce   :  { %710 = vmatpush3.bf16.msra.mxu0 %v753_v57 }
 0x1cf   :  { %711 = vmatprep.subr.bf16.mxu0 %v789_v0 }
 0x1d2   :  { %712 = vmatpush3.bf16.msra.mxu0 %v754_v58 }
 0x1d3   :  { %713 = vmatprep.subr.bf16.mxu0 %v789_v0 }
 0x1d6   :  { %714 = vmatpush3.bf16.msra.mxu0 %v755_v59 }
 0x279   :  { %v310_v48 = vpop.f32.mrf.mxu0 }
 0x27a   :  { %v311_v49 = vadd.f32 %v566_v47, %v310_v48 }
 0x27b   :  { %v677_v50 = vpop.f32.mrf.mxu0 }
 0x27c   :  { %760 = vtanh.f32 %v311_v49 }
 0x27d   :  { %v313_v51 = vpop.f32.mrf.mxu0 }
 0x27f   :  { %v678_v52 = vpop.f32.mrf.mxu0 }
 0x289   :  { %v761_v53 = vpop.eup %760 }
 0x28a   :  { %v317_v54 = vpack.c.bf16 %v761_v53, %v761_v53 }
 0x28c   :  { %696 = vmatmul.mubr.bf16.vlgmr.msra.gmra.mxu1 %v317_v54 }
 0x34c   :  { %v425_v61 = vpop.f32.mrf.mxu1 }
 0x34d   :  { %v426_v62 = vadd.f32 %v576_v60, %v425_v61 }
 0x34e   :  { %v697_v63 = vpop.f32.mrf.mxu1 }
 0x34f   :  { %762 = vtanh.f32 %v426_v62 }
 0x350   :  { %v428_v1 = vpop.f32.mrf.mxu1 }
 0x352   :  { %v698_v2 = vpop.f32.mrf.mxu1 }
 0x35c   :  { %v763_v3 = vpop.eup %762 }
 0x35d   :  { %v432_v4 = vpack.c.bf16 %v763_v3, %v763_v3 }
 0x35f   :  { %716 = vmatmul.mubr.bf16.vlgmr.msra.gmra.mxu0 %v432_v4 }
 0x41f   :  { %v540_v0 = vpop.f32.mrf.mxu0 }
 0x420   :  { %v541_v6 = vadd.f32 %v586_v5, %v540_v0 }
 0x421   :  { %v717_v7 = vpop.f32.mrf.mxu0 }
 0x422   :  { %v546_v8 = vpack.c.bf16 %v541_v6, %v541_v6 }
 0x423   :  { %v543_v9 = vpop.f32.mrf.mxu0 }
 0x424   :  { %547 = vst [vmem:[%s881_s3] sm:$0xf] %v546_v8 }
 0x425   :  { %v718_v10 = vpop.f32.mrf.mxu0 }
 0x426   :  { %552 = vsyncpa [#allocation3], 1 }

</bundles_post_ra>
